<compile_context>
chip_gen: v7x
topology: tpu7x:2x2x1
jax: 0.10.0
libtpu: 0.0.40
codegen_flags: <defaults>
</compile_context>

<pallas_src>
import math

import jax
import jax.numpy as jnp
from jax import lax
from jax.experimental import pallas as pl
from jax.experimental.pallas import tpu as pltpu

# ----------------------------- configuration --------------------------------
B = 2            # batch
C_IN = 4         # input channels
H = W = 16       # spatial
C_ENC = 8        # synthetic encoder out_channel
NUM_FEATURES = 32
NUM_CLASSES = 10
NUM_CLASSES_PAD = 128    # lane-dense head width (sliced back in the wrapper)
BN_EPS = 1e-5


# ------------------------------- kernel -------------------------------------
def vanilla_cnn_kernel(xcolT_ref, wc_ref, w1_ref, head_ref, out_ref):
    """Fused conv(im2col matmul) + concat-pool + MLP + batchnorm + classifier.

    xcolT_ref : (B, 9*C_IN+1, H*W)   bf16  transposed im2col + ones row (bias)
    wc_ref    : (B, C_ENC, 9*C_IN+1) bf16  flattened conv weight + bias column
                                           (broadcast over B -> batched matmul)
    w1_ref    : (2*C_ENC, F)         f32   fc Linear weight, (in, out) layout
    head_ref  : (8+F, 128)           f32   packed small params:
                                             row 0: b1    (first F lanes valid)
                                             row 1: gamma
                                             row 2: beta
                                             row 3: b2    (128-lane padded)
                                             rows 8..8+F: w2 (F,128), padded
    out_ref   : (B, 128)             f32   lane-dense logits (first NUM_CLASSES
                                           columns valid)
    """
    Cenc = wc_ref.shape[1]
    Fdim = w1_ref.shape[1]

    # --- encoder: Conv2d(3x3, pad=1) + bias + ReLU --------------------------
    # One batched bf16 MXU matmul onto a lane-dense (B, C_ENC, H*W) slab; the
    # conv bias rides the extra ones-row of the im2col K dimension.
    feat = jnp.einsum('bck,bkn->bcn', wc_ref[...], xcolT_ref[...],
                      preferred_element_type=jnp.float32)       # (B, C_ENC, HW)
    feat = jnp.maximum(feat, 0.0)

    # --- AdaptiveConcatPool2d((1,1)): global max & mean over spatial --------
    # Lane (XLU) reductions on the shared slab; no averaging matrix.
    maxp = jnp.max(feat, axis=-1)                                # (B, C_ENC)
    avgp = jnp.mean(feat, axis=-1)                               # (B, C_ENC)

    # --- fc: ReLU -> Linear(2*C_ENC, F) -> ReLU -> BatchNorm1d(F) -----------
    # Leading ReLU is the identity here (post-ReLU encoder) but kept so the
    # kernel stays correct if the backbone's last op changes; it is ~free.
    maxp = jnp.maximum(maxp, 0.0)
    avgp = jnp.maximum(avgp, 0.0)

    head = head_ref[...]                      # one (8+F, 128) parameter tile
    b1 = head[0:1, :Fdim]
    gamma = head[1:2, :Fdim]
    beta = head[2:3, :Fdim]
    b2 = head[3:4, :]
    w2 = head[8:8 + Fdim, :]                  # (F, 128) zero-padded classifier

    # concat([max, avg], 1) @ w1 == max @ w1[:C_ENC] + avg @ w1[C_ENC:]
    w1 = w1_ref[...]
    h = (jnp.dot(maxp, w1[:Cenc], preferred_element_type=jnp.float32)
         + jnp.dot(avgp, w1[Cenc:], preferred_element_type=jnp.float32)
         + b1)                                                   # (B, F)
    h = jnp.maximum(h, 0.0)

    # training-mode BatchNorm1d: biased batch statistics
    mu = jnp.mean(h, axis=0, keepdims=True)
    var = jnp.mean((h - mu) ** 2, axis=0, keepdims=True)
    h = (h - mu) * lax.rsqrt(var + BN_EPS) * gamma + beta

    # --- product: Linear(F, num_classes), lane-dense padded output ----------
    out_ref[...] = jnp.dot(h, w2, preferred_element_type=jnp.float32) + b2


# ------------------------------- wrapper -------------------------------------
def _im2col_3x3_same_T(x_nhwc):
    """(B, H, W, C) -> (B, 9*C, H*W) transposed im2col for a 3x3 / pad=1 conv."""
    b, h, w, c = x_nhwc.shape
    xp = jnp.pad(x_nhwc, ((0, 0), (1, 1), (1, 1), (0, 0)))
    taps = [xp[:, kh:kh + h, kw:kw + w, :] for kh in range(3) for kw in range(3)]
    col = jnp.concatenate(taps, axis=-1)             # (B, H, W, 9*C); feat=(kh,kw,c)
    return col.reshape(b, h * w, 9 * c).transpose(0, 2, 1)       # (B, 9*C, HW)


def _pad_row(v, width):
    v = v.reshape(1, -1)
    return jnp.pad(v, ((0, 0), (0, width - v.shape[1])))


@jax.jit
def vanilla_cnn_forward(x_nchw, params):
    """x_nchw: (B, C_IN, H, W) float32 — PyTorch layout. Returns (B, NUM_CLASSES)."""
    b = x_nchw.shape[0]

    # Glue (fuses into the jitted graph): layout change, im2col, bias folding,
    # bf16 casts, and the packed parameter tile.
    x_nhwc = jnp.transpose(x_nchw, (0, 2, 3, 1)).astype(jnp.float32)
    xcolT = _im2col_3x3_same_T(x_nhwc)                            # (B, 9*C_IN, HW)
    ones = jnp.ones((b, 1, xcolT.shape[-1]), jnp.float32)
    xcolT_aug = jnp.concatenate([xcolT, ones], axis=1).astype(jnp.bfloat16)

    wcT = params["wc"].reshape(9 * C_IN, C_ENC).T                 # (C_ENC, 9*C_IN)
    wc_aug = jnp.concatenate([wcT, params["bc"].reshape(C_ENC, 1)], axis=1)
    wc_b = jnp.broadcast_to(wc_aug[None], (b, C_ENC, 9 * C_IN + 1)
                            ).astype(jnp.bfloat16)                # (B, C_ENC, 37)

    # one (8 + F, 128) tile holding b1 / gamma / beta / b2 / padded w2
    head = jnp.concatenate([
        _pad_row(params["b1"], NUM_CLASSES_PAD),
        _pad_row(params["gamma"], NUM_CLASSES_PAD),
        _pad_row(params["beta"], NUM_CLASSES_PAD),
        _pad_row(params["b2"], NUM_CLASSES_PAD),
        jnp.zeros((4, NUM_CLASSES_PAD), jnp.float32),
        jnp.pad(params["w2"], ((0, 0), (0, NUM_CLASSES_PAD - NUM_CLASSES))),
    ], axis=0)                                                    # (8+F, 128)

    vmem = pl.BlockSpec(memory_space=pltpu.MemorySpace.VMEM)
    out_pad = pl.pallas_call(
        vanilla_cnn_kernel,
        out_shape=jax.ShapeDtypeStruct((b, NUM_CLASSES_PAD), jnp.float32),
        in_specs=[vmem] * 4,        # tiny arrays, fully VMEM-resident, 4 DMAs
        out_specs=vmem,
        # NOTE: no grid — BatchNorm1d couples the whole batch; see scaling
        # notes in the header for the real-backbone / v7x dual-TC plan.
    )(xcolT_aug, wc_b, params["w1"], head)
    return out_pad[:, :NUM_CLASSES]


# --------------------------- deterministic params -----------------------------
def xavier_normal(key, shape, fan_in, fan_out):
    std = math.sqrt(2.0 / (fan_in + fan_out))
    return (std * jax.random.normal(key, shape, jnp.float32)).astype(jnp.float32)


def init_params(key):
    k_conv, k_fc, k_prod = jax.random.split(key, 3)
    params = {
        # synthetic encoder conv (HWIO); xavier_normal_ like _init_module_params
        "wc": xavier_normal(k_conv, (3, 3, C_IN, C_ENC),
                            fan_in=C_IN * 9, fan_out=C_ENC * 9),
        "bc": jnp.zeros((1, C_ENC), jnp.float32),
        # fc Linear(2*C_ENC -> NUM_FEATURES), weight stored transposed (in, out)
        "w1": xavier_normal(k_fc, (2 * C_ENC, NUM_FEATURES),
                            fan_in=2 * C_ENC, fan_out=NUM_FEATURES),
        "b1": jnp.zeros((1, NUM_FEATURES), jnp.float32),
        # BatchNorm1d(NUM_FEATURES): weight=1, bias=0 (as _init_module_params)
        "gamma": jnp.ones((1, NUM_FEATURES), jnp.float32),
        "beta": jnp.zeros((1, NUM_FEATURES), jnp.float32),
        # product Linear(NUM_FEATURES -> NUM_CLASSES), transposed (in, out)
        "w2": xavier_normal(k_prod, (NUM_FEATURES, NUM_CLASSES),
                            fan_in=NUM_FEATURES, fan_out=NUM_CLASSES),
        "b2": jnp.zeros((1, NUM_CLASSES), jnp.float32),
    }
    return params


# ---------------------------------- main --------------------------------------
if __name__ == "__main__":
    key = jax.random.PRNGKey(0)
    k_params, k_input = jax.random.split(key)
    params = init_params(k_params)

    x = jax.random.normal(k_input, (B, C_IN, H, W), jnp.float32)   # NCHW input

    out = vanilla_cnn_forward(x, params)
    out = jax.block_until_ready(out)
    assert out.shape == (B, NUM_CLASSES) and out.dtype == jnp.float32
    print("KERNEL_OK")
</pallas_src>

<mosaic_0001>
module attributes {stable_mosaic.version = 11 : i64} {
  func.func @vanilla_cnn_kernel(%arg0: memref<2x37x256xbf16, #tpu.memory_space<vmem>>, %arg1: memref<2x8x37xbf16, #tpu.memory_space<vmem>>, %arg2: memref<16x32xf32, #tpu.memory_space<vmem>>, %arg3: memref<40x128xf32, #tpu.memory_space<vmem>>, %arg4: memref<2x128xf32, #tpu.memory_space<vmem>>) attributes {dimension_semantics = [], scalar_prefetch = 0 : i64, scratch_operands = 0 : i64, tpu.core_type = #tpu.core_type<tc>} {
    %c0 = arith.constant 0 : index
    %c0_0 = arith.constant 0 : index
    %c0_1 = arith.constant 0 : index
    %0 = vector.load %arg1[%c0, %c0_0, %c0_1] : memref<2x8x37xbf16, #tpu.memory_space<vmem>>, vector<2x8x37xbf16>
    %c0_2 = arith.constant 0 : index
    %c0_3 = arith.constant 0 : index
    %c0_4 = arith.constant 0 : index
    %1 = vector.load %arg0[%c0_2, %c0_3, %c0_4] : memref<2x37x256xbf16, #tpu.memory_space<vmem>>, vector<2x37x256xbf16>
    "tpu.trace_start"() <{level = 10 : i32, message = "bck,bkn->bcn"}> : () -> ()
    %cst = arith.constant dense<0.000000e+00> : vector<2x8x256xf32>
    %2 = tpu.matmul %0, %1, %cst {dimension_numbers = #tpu.dot_dimension_numbers<[2], [1], [1], [2], [0, 0, 0, 1, 1, 2], [0], [0]>} : vector<2x8x37xbf16>, vector<2x37x256xbf16>, vector<2x8x256xf32> -> vector<2x8x256xf32>
    "tpu.trace_stop"() : () -> ()
    %cst_5 = arith.constant 0.000000e+00 : f32
    %3 = vector.broadcast %cst_5 : f32 to vector<2x8x256xf32>
    %4 = arith.maximumf %2, %3 : vector<2x8x256xf32>
    %cst_6 = arith.constant dense<0xFF800000> : vector<2x8xf32>
    %5 = vector.multi_reduction <maximumf>, %4, %cst_6 [2] : vector<2x8x256xf32> to vector<2x8xf32>
    %cst_7 = arith.constant dense<0.000000e+00> : vector<2x8xf32>
    %6 = vector.multi_reduction <add>, %4, %cst_7 [2] : vector<2x8x256xf32> to vector<2x8xf32>
    %cst_8 = arith.constant 2.560000e+02 : f32
    %7 = vector.broadcast %cst_8 : f32 to vector<2x8xf32>
    %8 = arith.divf %6, %7 : vector<2x8xf32>
    %cst_9 = arith.constant 0.000000e+00 : f32
    %9 = vector.broadcast %cst_9 : f32 to vector<2x8xf32>
    %10 = arith.maximumf %5, %9 : vector<2x8xf32>
    %cst_10 = arith.constant 0.000000e+00 : f32
    %11 = vector.broadcast %cst_10 : f32 to vector<2x8xf32>
    %12 = arith.maximumf %8, %11 : vector<2x8xf32>
    %c0_11 = arith.constant 0 : index
    %c0_12 = arith.constant 0 : index
    %13 = vector.load %arg3[%c0_11, %c0_12] : memref<40x128xf32, #tpu.memory_space<vmem>>, vector<40x128xf32>
    %14 = vector.extract_strided_slice %13 {offsets = [0, 0], sizes = [1, 32], strides = [1, 1]} : vector<40x128xf32> to vector<1x32xf32>
    %15 = vector.extract_strided_slice %13 {offsets = [1, 0], sizes = [1, 32], strides = [1, 1]} : vector<40x128xf32> to vector<1x32xf32>
    %16 = vector.extract_strided_slice %13 {offsets = [2, 0], sizes = [1, 32], strides = [1, 1]} : vector<40x128xf32> to vector<1x32xf32>
    %17 = vector.extract_strided_slice %13 {offsets = [3, 0], sizes = [1, 128], strides = [1, 1]} : vector<40x128xf32> to vector<1x128xf32>
    %18 = vector.extract_strided_slice %13 {offsets = [8, 0], sizes = [32, 128], strides = [1, 1]} : vector<40x128xf32> to vector<32x128xf32>
    %c0_13 = arith.constant 0 : index
    %c0_14 = arith.constant 0 : index
    %19 = vector.load %arg2[%c0_13, %c0_14] : memref<16x32xf32, #tpu.memory_space<vmem>>, vector<16x32xf32>
    %20 = vector.extract_strided_slice %19 {offsets = [0, 0], sizes = [8, 32], strides = [1, 1]} : vector<16x32xf32> to vector<8x32xf32>
    %cst_15 = arith.constant dense<0.000000e+00> : vector<2x32xf32>
    %21 = tpu.matmul %10, %20, %cst_15 {dimension_numbers = #tpu.dot_dimension_numbers<[1], [0], [0], [1], [0, 0, 1, 1], [], []>} : vector<2x8xf32>, vector<8x32xf32>, vector<2x32xf32> -> vector<2x32xf32>
    %22 = vector.extract_strided_slice %19 {offsets = [8, 0], sizes = [8, 32], strides = [1, 1]} : vector<16x32xf32> to vector<8x32xf32>
    %cst_16 = arith.constant dense<0.000000e+00> : vector<2x32xf32>
    %23 = tpu.matmul %12, %22, %cst_16 {dimension_numbers = #tpu.dot_dimension_numbers<[1], [0], [0], [1], [0, 0, 1, 1], [], []>} : vector<2x8xf32>, vector<8x32xf32>, vector<2x32xf32> -> vector<2x32xf32>
    %24 = arith.addf %21, %23 : vector<2x32xf32>
    %25 = vector.broadcast %14 : vector<1x32xf32> to vector<2x32xf32>
    %26 = arith.addf %24, %25 : vector<2x32xf32>
    %cst_17 = arith.constant 0.000000e+00 : f32
    %27 = vector.broadcast %cst_17 : f32 to vector<2x32xf32>
    %28 = arith.maximumf %26, %27 : vector<2x32xf32>
    %cst_18 = arith.constant dense<0.000000e+00> : vector<32xf32>
    %29 = vector.multi_reduction <add>, %28, %cst_18 [0] : vector<2x32xf32> to vector<32xf32>
    %30 = vector.shape_cast %29 : vector<32xf32> to vector<1x32xf32>
    %cst_19 = arith.constant 2.000000e+00 : f32
    %31 = vector.broadcast %cst_19 : f32 to vector<1x32xf32>
    %32 = arith.divf %30, %31 : vector<1x32xf32>
    %33 = vector.broadcast %32 : vector<1x32xf32> to vector<2x32xf32>
    %34 = arith.subf %28, %33 : vector<2x32xf32>
    %35 = arith.mulf %34, %34 : vector<2x32xf32>
    %cst_20 = arith.constant dense<0.000000e+00> : vector<32xf32>
    %36 = vector.multi_reduction <add>, %35, %cst_20 [0] : vector<2x32xf32> to vector<32xf32>
    %37 = vector.shape_cast %36 : vector<32xf32> to vector<1x32xf32>
    %cst_21 = arith.constant 2.000000e+00 : f32
    %38 = vector.broadcast %cst_21 : f32 to vector<1x32xf32>
    %39 = arith.divf %37, %38 : vector<1x32xf32>
    %40 = vector.broadcast %32 : vector<1x32xf32> to vector<2x32xf32>
    %41 = arith.subf %28, %40 : vector<2x32xf32>
    %cst_22 = arith.constant 9.99999974E-6 : f32
    %42 = vector.broadcast %cst_22 : f32 to vector<1x32xf32>
    %43 = arith.addf %39, %42 : vector<1x32xf32>
    %44 = math.rsqrt %43 : vector<1x32xf32>
    %45 = vector.broadcast %44 : vector<1x32xf32> to vector<2x32xf32>
    %46 = arith.mulf %41, %45 : vector<2x32xf32>
    %47 = vector.broadcast %15 : vector<1x32xf32> to vector<2x32xf32>
    %48 = arith.mulf %46, %47 : vector<2x32xf32>
    %49 = vector.broadcast %16 : vector<1x32xf32> to vector<2x32xf32>
    %50 = arith.addf %48, %49 : vector<2x32xf32>
    %cst_23 = arith.constant dense<0.000000e+00> : vector<2x128xf32>
    %51 = tpu.matmul %50, %18, %cst_23 {dimension_numbers = #tpu.dot_dimension_numbers<[1], [0], [0], [1], [0, 0, 1, 1], [], []>} : vector<2x32xf32>, vector<32x128xf32>, vector<2x128xf32> -> vector<2x128xf32>
    %52 = vector.broadcast %17 : vector<1x128xf32> to vector<2x128xf32>
    %53 = arith.addf %51, %52 : vector<2x128xf32>
    %c0_24 = arith.constant 0 : index
    %c0_25 = arith.constant 0 : index
    %54 = vector.load %arg4[%c0_24, %c0_25] : memref<2x128xf32, #tpu.memory_space<vmem>>, vector<2x128xf32>
    tpu.vector_store %arg4[%c0_24, %c0_25], %53 {strides = array<i32>} : memref<2x128xf32, #tpu.memory_space<vmem>>, vector<2x128xf32>,
    return
  }
}

</mosaic_0001>

<bundles_post_ra>
// kernel: vanilla_cnn_forward.1
= control target key start
LH: loop header
LB: loop body
LE: loop exit
PB: predicated region body
PF: predicated region fallthrough
CT: control target
= control target key end

     0   :  { %vm60_vm0 = vcmask 1041408   ;;  %vm61_vm1 = vcmask 1042432   ;;  %v619_v4 = vmov 65535   ;;  %v620_v6 = vmov 0   ;;  %s729_s0 = inlined_call_operand.vmem [shape: bf16[2,37,256], index: 0, kind: input, shape index: {}]   ;;  %s730_s1 = inlined_call_operand.vmem [shape: bf16[2,8,37], index: 1, kind: input, shape index: {}]   ;;  %s731_s2 = inlined_call_operand.vmem [shape: f32[16,32], index: 2, kind: input, shape index: {}]   ;;  %s732_s3 = inlined_call_operand.vmem [shape: f32[40,128], index: 3, kind: input, shape index: {}]   ;;  %s733_s4 = inlined_call_operand.hbm [shape: f32[2,128], index: 4, kind: output, shape index: {}]  }
   0x1   :  { %v577_v0 = vld [vmem:[%s729_s0 + $0x4] ss:$8 sps:$4 sm:$0xff]   ;;  %v579_v1 = vld [vmem:[%s729_s0] ss:$8 sps:$4 sm:$0xff]   ;;  %v62_v5 = vsel %vm60_vm0, 4294967295, %v619_v4  ;;  %102 = vmatprep.mubr.bf16.mxu0 %v620_v6  ;;  %177 = vmatprep.mubr.bf16.mxu1 %v620_v6 }
   0x2   :  { %70 = vmatprep.subr.bf16.mxu0 %v577_v0  ;;  %v580_v2 = vld [vmem:[%s729_s0 + $0x2c] ss:$8 sps:$4 sm:$0xff]   ;;  %v582_v3 = vld [vmem:[%s729_s0 + $0x28] ss:$8 sps:$4 sm:$0xff]   ;;  %v586_v9 = vld [vmem:[%s729_s0 + $0x3c] ss:$8 sps:$4 sm:$0xff]  }
   0x3   :  { %71 = vmatpush1.bf16.msra.mxu0 %v579_v1  ;;  %v583_v7 = vld [vmem:[%s729_s0 + $0x14] ss:$8 sps:$4 sm:$0xff]   ;;  %v585_v8 = vld [vmem:[%s729_s0 + $0x10] ss:$8 sps:$4 sm:$0xff]   ;;  %145 = vmatprep.subr.bf16.mxu1 %v580_v2  ;;  %v63_v10 = vsel %vm61_vm1, %v62_v5, 0 }
   0x4   :  { %146 = vmatpush1.bf16.msra.mxu1 %v582_v3  ;;  %72 = vmatprep.subr.bf16.mxu0 %v583_v7  ;;  %v588_v11 = vld [vmem:[%s729_s0 + $0x38] ss:$8 sps:$4 sm:$0xff]   ;;  %v30_v13 = vld [vmem:[%s729_s0 + $0x48] sm:$0x77] }
   0x5   :  { %v25_v12 = vld [vmem:[%s729_s0 + $0x20] sm:$0x77]  ;;  %147 = vmatprep.subr.bf16.mxu1 %v586_v9  ;;  %v530_v16 = vcombine.high %v30_v13, %v30_v13  ;;  %v529_v17 = vcombine.low %v30_v13, %v30_v13 }
   0x6   :  { %v523_v14 = vcombine.high %v25_v12, %v25_v12  ;;  %v522_v15 = vcombine.low %v25_v12, %v25_v12 }
   0x7   :  { %9 = vsyncpa [#allocation3], 0  ;;  %73 = vmatpush1.bf16.msra.mxu0 %v585_v8  ;;  %v143_v20 = vand.u32 %v530_v16, %v63_v10  ;;  %v140_v21 = vand.u32 %v529_v17, %v63_v10  ;;  %v19_v22 = vld [vmem:[%s730_s1] sm:$0xf]  ;;  %vm56_vm2 = vcmask 302080   ;;  %v215_v40 = vld [vmem:[%s731_s2 + $0x8] sm:$0xff]  ;;  %v218_v42 = vlaneseq }
   0x8   :  { %v68_v18 = vand.u32 %v523_v14, %v63_v10  ;;  %v65_v19 = vand.u32 %v522_v15, %v63_v10  ;;  %148 = vmatpush1.bf16.msra.mxu1 %v588_v11  ;;  %v20_v23 = vld [vmem:[%s730_s1 + $0x4] sm:$0xf]  ;;  %v621_v41 = vmov 0.0   ;;  %vm622_vm3 = vmmov 0   ;;  %v210_v63 = vld [vmem:[%s732_s3 + $0x8] sm:$0xff]  ;;  %v211_v0 = vld [vmem:[%s732_s3 + $0x10] sm:$0xff] }
   0x9   :  { %149 = vmatprep.subr.bf16.mxu1 %v143_v20  ;;  %v219_v46 = vand.u32 127, %v218_v42  ;;  %v691_v47 = vshrl.u32 %v218_v42, 7  ;;  %vm230_vm4 = vcmask 64512   ;;  %vm228_vm5 = vcmask 1041409   ;;  %v214_v58 = vld [vmem:[%s731_s2] sm:$0xff]  ;;  %v212_v3 = vld [vmem:[%s732_s3 + $0x18] sm:$0xff] }
   0xa   :  { %74 = vmatprep.subr.bf16.mxu0 %v68_v18  ;;  %v566_v1 = vpack.c.bf16 %v211_v0, %v210_v63  ;;  %v623_v2 = vmov 0.0|0.0   ;;  %v213_v4 = vld [vmem:[%s732_s3 + $0x20] sm:$0xff]  ;;  %vm392_vm6 = vcmask 254976   ;;  %vm429_vm7 = vcmask 261120  }
   0xb   :  { %75 = vmatpush1.bf16.msra.mxu0 %v65_v19  ;;  %v222_v52 = vsub.s32 %v219_v46, %v691_v47  ;;  %v569_v5 = vpack.c.bf16 %v213_v4, %v212_v3  ;;  %v388_v6 = vsub.s32 0, %v691_v47  ;;  %v209_v8 = vld [vmem:[%s732_s3] sm:$0xff]  ;;  %s624_s3 = smov [#allocation2]  }
   0xc   :  { %150 = vmatpush1.bf16.msra.mxu1 %v140_v21  ;;  %565 = vmatprep.subr.bf16.mxu0 %v623_v2  ;;  %s510_s24 = sshll.u32 %s624_s3, 4  ;;  %s511_s24 = int_to_ptr.vmem [resolvable:$true] %s510_s24 }
   0xd   :  { %544 = vmatprep.subr.mxu1 %v621_v41  ;;  %v389_v10 = vrot.slane %v209_v8, %v388_v6  ;;  %s595_s25 = scalar_lea.vmem %s511_s24, 32  ;;  %p600_p1 = scmp.lt.s32.totalorder %s511_s24, %s511_s24 }
   0xe   :  { %524 = vmatmul.mubr.msk.bf16.vlgmr.msra.gmra.mrb[0].mxu0 %vm56_vm2, %v19_v22  ;;  %p596_p0 = scmp.ne.s32.totalorder %s511_s24, %s595_s25  ;;  %p601_p2 = scmp.lt.s32.totalorder %s595_s25, %s595_s25 }
   0xf   :  { %531 = vmatmul.mubr.msk.bf16.vlgmr.msra.gmra.mrb[0].mxu1 %vm56_vm2, %v20_v23  ;;  %562 = vmatprep.mubr.msk.f32.mxu0 %vm622_vm3, %v621_v41 }
  0x10   :  { %545 = vmatpush3.msra.mxu1 %v215_v40  ;;  %546 = vmatprep.mubr.msk.f32.mxu1 %vm622_vm3, %v621_v41  ;;  %p602_p3 = por %p601_p2, %p600_p1 }
  0x11   :  { %549 = vmatprep.subr.mxu1 %v621_v41  ;;  %567 = vmatpush3.bf16.msra.mxu0 %v566_v1 }
  0x12   :  { %568 = vmatprep.subr.bf16.mxu0 %v623_v2  ;;  %p603_p4 = pnand %p602_p3, %p596_p0 }
  0x15   :  { %570 = vmatpush3.bf16.msra.mxu0 %v569_v5 }
  0xe1   :  { %v104_v24 = vpop.f32.mrb[0].mxu0 }
  0xe2   :  { %v186_v25 = vmax.f32 %v104_v24, 0.0  ;;  %v106_v26 = vpop.f32.mrb[1].mxu0  ;;  %v179_v28 = vpop.f32.mrb[0].mxu1 }
  0xe3   :  { %v187_v27 = vmax.f32 %v106_v26, 0.0  ;;  %v108_v29 = vpop.f32.mrb[2].mxu0  ;;  %v188_v30 = vmax.f32 %v179_v28, 0.0  ;;  %v181_v31 = vpop.f32.mrb[1].mxu1 }
  0xe4   :  { %v109_v32 = vpop.f32.mrb[3].mxu0  ;;  %v189_v33 = vmax.f32 %v181_v31, 0.0  ;;  %v183_v34 = vpop.f32.mrb[2].mxu1 }
  0xe5   :  { %v196_v35 = vadd.f32 %v187_v27, %v186_v25  ;;  %v190_v36 = vmax.f32 %v186_v25, %v187_v27  ;;  %v184_v37 = vpop.f32.mrb[3].mxu1 }
  0xe6   :  { %v199_v38 = vadd.f32 %v189_v33, %v188_v30  ;;  %v193_v39 = vmax.f32 %v188_v30, %v189_v33 }
  0xe7   :  { %197 = vadd.xlane.f32.xlu0 %v196_v35  ;;  %191 = vmax.xlane.f32.xlu1 %v190_v36  ;;  %v417_v35 = vsub.s32 1, %v691_v47  ;;  %v422_v36 = vsub.s32 2, %v691_v47 }
  0xe9   :  { %v418_v37 = vrot.slane %v209_v8, %v417_v35  ;;  %v423_v40 = vrot.slane %v209_v8, %v422_v36 }
  0xeb   :  { %200 = vadd.xlane.f32.xlu0 %v199_v38  ;;  %194 = vmax.xlane.f32.xlu1 %v193_v39 }
 0x174   :  { %v198_v43 = vpop.xlane.xlu0 %197  ;;  %v192_v44 = vpop.xlane.xlu1 %191 }
 0x175   :  { %v203_v45 = vmul.f32 0.00390625, %v198_v43  ;;  %v205_v56 = vmax.f32 %v192_v44, 0.0  ;;  %v427_v43 = vsub.s32 3, %v691_v47 }
 0x177   :  { %v207_v50 = vmax.f32 %v203_v45, 0.0  ;;  %v308_v61 = vrot.slane %v205_v56, %v222_v52  ;;  %v428_v44 = vrot.slane %v209_v8, %v427_v43 }
 0x178   :  { %v201_v48 = vpop.xlane.xlu0 %200  ;;  %v195_v49 = vpop.xlane.xlu1 %194 }
 0x179   :  { %v204_v51 = vmul.f32 0.00390625, %v201_v48  ;;  %v206_v54 = vmax.f32 %v195_v49, 0.0  ;;  %v223_v55 = vrot.slane %v207_v50, %v222_v52 }
 0x17b   :  { %v208_v53 = vmax.f32 %v204_v51, 0.0  ;;  %v312_v59 = vrot.slane %v206_v54, %v222_v52 }
 0x17d   :  { %v227_v57 = vrot.slane %v208_v53, %v222_v52  ;;  %v313_v62 = vsel %vm228_vm5, %v312_v59, %v308_v61 }
 0x17f   :  { %v229_v60 = vsel %vm228_vm5, %v227_v57, %v223_v55 }
 0x180   :  { %547 = vmatmul.mubr.msk.f32.vlgmr.msra.gmra.mrb[4].mxu1 %vm230_vm4, %v229_v60 }
 0x181   :  { %550 = vmatpush3.msra.mxu1 %v214_v58  ;;  %551 = vmatprep.mubr.msk.f32.mxu1 %vm622_vm3, %v621_v41 }
 0x184   :  { %552 = vmatmul.mubr.msk.f32.vlgmr.msra.gmra.mrb[6].mxu1 %vm230_vm4, %v313_v62 }
 0x253   :  { %v299_v7 = vpop.f32.mrb[4].mxu1 }
 0x254   :  { %v548_v9 = vpop.f32.mrb[5].mxu1 }
 0x257   :  { %v382_v11 = vpop.f32.mrb[6].mxu1 }
 0x258   :  { %v383_v12 = vadd.f32 %v382_v11, %v299_v7  ;;  %v553_v13 = vpop.f32.mrb[7].mxu1 }
 0x25a   :  { %v390_v14 = vadd.f32 %v389_v10, %v383_v12 }
 0x25c   :  { %v391_v15 = vmax.f32 %v390_v14, 0.0 }
 0x25e   :  { %v393_v16 = vsel %vm392_vm6, %v391_v15, 0.0 }
 0x25f   :  { %v394_v17 = vrot.slane %v393_v16, 4 }
 0x261   :  { %v395_v18 = vadd.f32 %v394_v17, %v393_v16 }
 0x263   :  { %v396_v19 = vrot.slane %v395_v18, 2 }
 0x265   :  { %v397_v20 = vadd.f32 %v396_v19, %v395_v18 }
 0x267   :  { %v398_v21 = vrot.slane %v397_v20, 1 }
 0x269   :  { %v399_v22 = vadd.f32 %v398_v21, %v397_v20 }
 0x26b   :  { %v401_v23 = vmul.f32 0.5, %v399_v22 }
 0x26d   :  { %v402_v24 = vsub.f32 %v391_v15, %v401_v23 }
 0x26f   :  { %v403_v25 = vmul.f32 %v402_v24, %v402_v24 }
 0x271   :  { %v404_v26 = vsel %vm392_vm6, %v403_v25, 0.0 }
 0x272   :  { %v405_v27 = vrot.slane %v404_v26, 4 }
 0x274   :  { %v406_v28 = vadd.f32 %v405_v27, %v404_v26 }
 0x276   :  { %v407_v29 = vrot.slane %v406_v28, 2 }
 0x278   :  { %v408_v30 = vadd.f32 %v407_v29, %v406_v28 }
 0x27a   :  { %v409_v31 = vrot.slane %v408_v30, 1 }
 0x27c   :  { %v410_v32 = vadd.f32 %v409_v31, %v408_v30 }
 0x27e   :  { %v411_v33 = vmul.f32 0.5, %v410_v32 }
 0x280   :  { %v412_v34 = vadd.f32 1e-05, %v411_v33 }
 0x282   :  { %593 = vrsqrt.f32 %v412_v34 }
 0x28c   :  { %v594_v38 = vpop.eup %593 }
 0x28d   :  { %v414_v39 = vmul.f32 %v594_v38, %v402_v24 }
 0x28f   :  { %v419_v41 = vmul.f32 %v418_v37, %v414_v39 }
 0x291   :  { %v424_v42 = vadd.f32 %v423_v40, %v419_v41 }
 0x293   :  { %563 = vmatmul.mubr.msk.f32.vlgmr.msra.gmra.mrb[4].mxu0 %vm429_vm7, %v424_v42 }
 0x366   :  { %v499_v45 = vpop.f32.mrb[4].mxu0 }
 0x367   :  { %v500_v46 = vadd.f32 %v499_v45, %v428_v44  ;;  %v564_v48 = vpop.f32.mrb[5].mxu0 }
 0x369   :  { %503 = vst [vmem:[#allocation2] sm:$0x3] %v500_v46 }
 0x36a   :  { %606 = shalt.err (!%p603_p4)
}
 0x36b   :  { %s607_s28 = scalar_lea.hbm %s733_s4, 32 }
 0x36c   :  { %p608_p5 = scmp.ne.s32.totalorder %s733_s4, %s607_s28  ;;  %p611_p6 = scmp.lt.u32.totalorder %s607_s28, %s733_s4 }
 0x36e   :  { %p613_p7 = pnand %p611_p6, %p608_p5 }
 0x370   :  { %616 = shalt.err (!%p613_p7)
}
 0x371   :  { %513 = dma.vmem_to_hbm [thread:$0]  %s511_s24, 32, %s733_s4, [#allocation3]  }
 0x372   :  { %617 = dma.done.wait [#allocation3], 32  }
 0x373   :  { %618 = vsyncadd [#allocation3], 4294967264 }
 0x374   :  { %517 = vsyncpa [#allocation3], 1 }

</bundles_post_ra>
